<compile_context>
chip_gen: v5e
topology: v5e:2x2
jax: 0.10.0
libtpu: 0.0.40
codegen_flags: <defaults>
</compile_context>

<pallas_src>
import math
from functools import partial

import jax
import jax.numpy as jnp
import numpy as np
from jax import lax
from jax.experimental import pallas as pl
from jax.experimental.pallas import tpu as pltpu


def _mha_kernel(q_ref, k_ref, v_ref, wqT_ref, wkT_ref, wvT_ref, woT_ref, o_ref,
                *, h: int, d_k: int, d_v: int):
    """One grid step == one (batch element, query tile).

    q_ref             : [Tq, d_model] bf16 (batch dim squeezed)
    k_ref, v_ref      : [S,  d_model] bf16 (full key/value sequence)
    wqT_ref, wkT_ref  : [d_model, h*d_k] bf16 (pre-transposed; scale folded in wqT)
    wvT_ref           : [d_model, h*d_v] bf16
    woT_ref           : [h*d_v, d_model] bf16
    o_ref             : [Tq, d_model] f32
    """
    q = q_ref[...]
    k = k_ref[...]
    v = v_ref[...]

    # Stacked per-head projections: one wide bf16 matmul each (good MXU N-fill),
    # f32 accumulation. Softmax scale is pre-folded into wqT.
    qp = jnp.dot(q, wqT_ref[...], preferred_element_type=jnp.float32)  # [Tq, h*d_k]
    kp = jnp.dot(k, wkT_ref[...], preferred_element_type=jnp.float32)  # [S,  h*d_k]
    vp = jnp.dot(v, wvT_ref[...], preferred_element_type=jnp.float32)  # [S,  h*d_v]

    # Contract the last dims of both operands (== q @ k.mT and scores @ v.mT)
    # without any in-kernel transpose.
    contract_last = (((1,), (1,)), ((), ()))

    tq = q.shape[0]
    d_model = o_ref.shape[-1]
    acc = jnp.zeros((tq, d_model), jnp.float32)

    # NOTE: Python loop (h is static & small) rather than fori_loop because the
    # per-head lane offsets (i*d_k, i*d_v) are not 128-multiples, so they must
    # stay static; the acc dependence chain keeps only one head live at a time.
    for i in range(h):
        qh = qp[:, i * d_k:(i + 1) * d_k].astype(jnp.bfloat16)
        kh = kp[:, i * d_k:(i + 1) * d_k].astype(jnp.bfloat16)
        vh = vp[:, i * d_v:(i + 1) * d_v].astype(jnp.bfloat16)

        logits = lax.dot_general(qh, kh, contract_last,
                                 preferred_element_type=jnp.float32)   # [Tq, S]
        logits = logits - jnp.max(logits, axis=-1, keepdims=True)
        e = jnp.exp(logits)
        # EUP approximate reciprocal instead of an O(Tq*S) f32 divide.
        inv_denom = pl.reciprocal(jnp.sum(e, axis=-1, keepdims=True), approx=True)
        probs = (e * inv_denom).astype(jnp.bfloat16)

        # Matches torch exactly: scores @ v.mT (requires d_v == S).
        head = lax.dot_general(probs, vh, contract_last,
                               preferred_element_type=jnp.float32)     # [Tq, S]

        # Fold this head straight into the output projection:
        #   concat(heads) @ Wo.T  ==  sum_i head_i @ Wo.T[i*d_v:(i+1)*d_v, :]
        acc = acc + jnp.dot(head.astype(jnp.bfloat16),
                            woT_ref[i * d_v:(i + 1) * d_v, :],
                            preferred_element_type=jnp.float32)        # [Tq, d_model]

    # Single store of the output tile.
    o_ref[...] = acc


def _pick_q_tile(S: int) -> int:
    """Query-sequence tile: full S when small, else a 128-multiple divisor."""
    if S <= 512:
        return S
    for t in (512, 256, 128):
        if S % t == 0:
            return t
    return S  # fallback: no tiling


def multi_headed_attention(q, k, v, wq, wk, wv, wo, scale=None):
    """q,k,v: [B,S,d_model]; wq,wk: [h,d_k,d_model]; wv: [h,d_v,d_model];
    wo: [d_model, h*d_v]. Returns [B,S,d_model] (float32)."""
    B, S, d_model = q.shape
    h, d_k, _ = wq.shape
    d_v = wv.shape[1]
    assert d_v == S, "torch module's scores @ v.mT requires d_v == sequence length"
    if scale is None:
        scale = 1.0 / math.sqrt(d_k)

    Tq = _pick_q_tile(S)
    n_qt = S // Tq

    # Host-side weight re-layout (free): concat per-head transposed weights along
    # the output-feature axis, fold the softmax scale into Wq, cast to bf16.
    wqT = (wq.transpose(2, 0, 1).reshape(d_model, h * d_k) * float(scale)).astype(jnp.bfloat16)
    wkT = wk.transpose(2, 0, 1).reshape(d_model, h * d_k).astype(jnp.bfloat16)
    wvT = wv.transpose(2, 0, 1).reshape(d_model, h * d_v).astype(jnp.bfloat16)
    woT = wo.T.astype(jnp.bfloat16)

    qb = q.astype(jnp.bfloat16)
    kb = k.astype(jnp.bfloat16)
    vb = v.astype(jnp.bfloat16)

    # Explicit VMEM budget (double-buffered activation blocks + resident
    # weight slabs + in-kernel f32 intermediates), capped at v7x's 64 MiB.
    blk_bytes = 2 * (Tq * d_model * 2 + 2 * S * d_model * 2 + Tq * d_model * 4)
    wt_bytes = 2 * 2 * (2 * d_model * h * d_k + 2 * d_model * h * d_v)
    tmp_bytes = 4 * (Tq * h * d_k + S * h * d_k + S * h * d_v + 3 * Tq * S + Tq * d_model)
    vmem_limit = int(min(64 << 20, max(32 << 20, 2 * (blk_bytes + wt_bytes + tmp_bytes))))

    kernel = partial(_mha_kernel, h=h, d_k=d_k, d_v=d_v)
    out = pl.pallas_call(
        kernel,
        out_shape=jax.ShapeDtypeStruct((B, S, d_model), jnp.float32),
        grid_spec=pltpu.PrefetchScalarGridSpec(
            num_scalar_prefetch=0,
            grid=(B, n_qt),
            in_specs=[
                # Q moves per (batch, q-tile); K/V are q-tile-invariant so they
                # are DMA'd once per batch element and stay resident.
                pl.BlockSpec((pl.Squeezed(), Tq, d_model), lambda b, t: (b, t, 0)),  # q
                pl.BlockSpec((pl.Squeezed(), S, d_model), lambda b, t: (b, 0, 0)),   # k
                pl.BlockSpec((pl.Squeezed(), S, d_model), lambda b, t: (b, 0, 0)),   # v
                # Weights: constant index maps -> loaded once, resident in VMEM.
                pl.BlockSpec((d_model, h * d_k), lambda b, t: (0, 0)),               # WqT (scaled)
                pl.BlockSpec((d_model, h * d_k), lambda b, t: (0, 0)),               # WkT
                pl.BlockSpec((d_model, h * d_v), lambda b, t: (0, 0)),               # WvT
                pl.BlockSpec((h * d_v, d_model), lambda b, t: (0, 0)),               # WoT
            ],
            out_specs=pl.BlockSpec((pl.Squeezed(), Tq, d_model), lambda b, t: (b, t, 0)),
        ),
        compiler_params=pltpu.CompilerParams(
            dimension_semantics=("parallel", "parallel"),
            vmem_limit_bytes=vmem_limit),
    )(qb, kb, vb, wqT, wkT, wvT, woT)
    return out


def reference(q, k, v, wq, wk, wv, wo, scale=None):
    """Pure-JAX f32 reference mirroring the torch forward (mask=None path)."""
    h, d_k, _ = wq.shape
    if scale is None:
        scale = 1.0 / math.sqrt(d_k)
    outs = []
    for i in range(h):
        qp = q @ wq[i].T
        kp = k @ wk[i].T
        vp = v @ wv[i].T
        logits = scale * (qp @ kp.transpose(0, 2, 1))
        s = jax.nn.softmax(logits, axis=-1)
        outs.append(s @ vp.transpose(0, 2, 1))
    concat = jnp.concatenate(outs, -1)
    return concat @ wo.T


# TODO(synk): mask path not implemented — the original torch code raises for any
# non-None mask (it compares an int to a list), so only mask=None is meaningful.

if __name__ == "__main__":
    key = jax.random.PRNGKey(0)
    B, S = 2, 8
    d_model, d_k, d_v, h = 32, 16, 8, 2  # module semantics require S == d_v

    ks = jax.random.split(key, 7)
    q = jax.random.normal(ks[0], (B, S, d_model), jnp.float32)
    k = jax.random.normal(ks[1], (B, S, d_model), jnp.float32)
    v = jax.random.normal(ks[2], (B, S, d_model), jnp.float32)

    def lin_init(kk, out_dim, in_dim):
        bound = 1.0 / math.sqrt(in_dim)  # torch.nn.Linear default uniform bound
        return jax.random.uniform(kk, (out_dim, in_dim), jnp.float32, -bound, bound)

    wq = jnp.stack([lin_init(kk, d_k, d_model) for kk in jax.random.split(ks[3], h)])
    wk = jnp.stack([lin_init(kk, d_k, d_model) for kk in jax.random.split(ks[4], h)])
    wv = jnp.stack([lin_init(kk, d_v, d_model) for kk in jax.random.split(ks[5], h)])
    wo = lin_init(ks[6], d_model, h * d_v)

    out = multi_headed_attention(q, k, v, wq, wk, wv, wo)
    jax.block_until_ready(out)

    ref = reference(q, k, v, wq, wk, wv, wo)
    # Tolerances widened vs. an f32 kernel: matmul operands are bf16 (f32
    # accumulation) and the softmax denominator uses the EUP approximate
    # reciprocal (~2^-12 relative error).
    np.testing.assert_allclose(np.asarray(out), np.asarray(ref), rtol=3e-2, atol=3e-2)
    print("KERNEL_OK")
</pallas_src>

<mosaic_0001>
module attributes {stable_mosaic.version = 11 : i64} {
  func.func @_mha_kernel(%arg0: i32, %arg1: i32, %arg2: memref<1x8x32xbf16, #tpu.memory_space<vmem>>, %arg3: memref<1x8x32xbf16, #tpu.memory_space<vmem>>, %arg4: memref<1x8x32xbf16, #tpu.memory_space<vmem>>, %arg5: memref<32x32xbf16, #tpu.memory_space<vmem>>, %arg6: memref<32x32xbf16, #tpu.memory_space<vmem>>, %arg7: memref<32x16xbf16, #tpu.memory_space<vmem>>, %arg8: memref<16x32xbf16, #tpu.memory_space<vmem>>, %arg9: memref<1x8x32xf32, #tpu.memory_space<vmem>>) attributes {dimension_semantics = [#tpu.dimension_semantics<parallel>, #tpu.dimension_semantics<parallel>], iteration_bounds = array<i64: 2, 1>, scalar_prefetch = 0 : i64, scratch_operands = 0 : i64, tpu.core_type = #tpu.core_type<tc>, window_params = [{transform_indices = @transform_0, window_bounds = array<i64: 1, 8, 32>}, {transform_indices = @transform_1, window_bounds = array<i64: 1, 8, 32>}, {transform_indices = @transform_2, window_bounds = array<i64: 1, 8, 32>}, {pipeline_mode = #tpu.pipeline_mode<synchronous>, transform_indices = @transform_3, window_bounds = array<i64: 32, 32>}, {pipeline_mode = #tpu.pipeline_mode<synchronous>, transform_indices = @transform_4, window_bounds = array<i64: 32, 32>}, {pipeline_mode = #tpu.pipeline_mode<synchronous>, transform_indices = @transform_5, window_bounds = array<i64: 32, 16>}, {pipeline_mode = #tpu.pipeline_mode<synchronous>, transform_indices = @transform_6, window_bounds = array<i64: 16, 32>}, {transform_indices = @transform_7, window_bounds = array<i64: 1, 8, 32>}]} {
    %c0 = arith.constant 0 : index
    %c0_0 = arith.constant 0 : index
    %c0_1 = arith.constant 0 : index
    %0 = vector.load %arg2[%c0, %c0_0, %c0_1] : memref<1x8x32xbf16, #tpu.memory_space<vmem>>, vector<1x8x32xbf16>
    %1 = vector.shape_cast %0 : vector<1x8x32xbf16> to vector<8x32xbf16>
    %c0_2 = arith.constant 0 : index
    %c0_3 = arith.constant 0 : index
    %c0_4 = arith.constant 0 : index
    %2 = vector.load %arg3[%c0_2, %c0_3, %c0_4] : memref<1x8x32xbf16, #tpu.memory_space<vmem>>, vector<1x8x32xbf16>
    %3 = vector.shape_cast %2 : vector<1x8x32xbf16> to vector<8x32xbf16>
    %c0_5 = arith.constant 0 : index
    %c0_6 = arith.constant 0 : index
    %c0_7 = arith.constant 0 : index
    %4 = vector.load %arg4[%c0_5, %c0_6, %c0_7] : memref<1x8x32xbf16, #tpu.memory_space<vmem>>, vector<1x8x32xbf16>
    %5 = vector.shape_cast %4 : vector<1x8x32xbf16> to vector<8x32xbf16>
    %c0_8 = arith.constant 0 : index
    %c0_9 = arith.constant 0 : index
    %6 = vector.load %arg5[%c0_8, %c0_9] : memref<32x32xbf16, #tpu.memory_space<vmem>>, vector<32x32xbf16>
    %cst = arith.constant dense<0.000000e+00> : vector<8x32xf32>
    %7 = tpu.matmul %1, %6, %cst {dimension_numbers = #tpu.dot_dimension_numbers<[1], [0], [0], [1], [0, 0, 1, 1], [], []>} : vector<8x32xbf16>, vector<32x32xbf16>, vector<8x32xf32> -> vector<8x32xf32>
    %c0_10 = arith.constant 0 : index
    %c0_11 = arith.constant 0 : index
    %8 = vector.load %arg6[%c0_10, %c0_11] : memref<32x32xbf16, #tpu.memory_space<vmem>>, vector<32x32xbf16>
    %cst_12 = arith.constant dense<0.000000e+00> : vector<8x32xf32>
    %9 = tpu.matmul %3, %8, %cst_12 {dimension_numbers = #tpu.dot_dimension_numbers<[1], [0], [0], [1], [0, 0, 1, 1], [], []>} : vector<8x32xbf16>, vector<32x32xbf16>, vector<8x32xf32> -> vector<8x32xf32>
    %c0_13 = arith.constant 0 : index
    %c0_14 = arith.constant 0 : index
    %10 = vector.load %arg7[%c0_13, %c0_14] : memref<32x16xbf16, #tpu.memory_space<vmem>>, vector<32x16xbf16>
    %cst_15 = arith.constant dense<0.000000e+00> : vector<8x16xf32>
    %11 = tpu.matmul %5, %10, %cst_15 {dimension_numbers = #tpu.dot_dimension_numbers<[1], [0], [0], [1], [0, 0, 1, 1], [], []>} : vector<8x32xbf16>, vector<32x16xbf16>, vector<8x16xf32> -> vector<8x16xf32>
    %cst_16 = arith.constant 0.000000e+00 : f32
    %12 = vector.broadcast %cst_16 : f32 to vector<8x32xf32>
    %13 = vector.extract_strided_slice %7 {offsets = [0, 0], sizes = [8, 16], strides = [1, 1]} : vector<8x32xf32> to vector<8x16xf32>
    %14 = arith.truncf %13 : vector<8x16xf32> to vector<8x16xbf16>
    %15 = vector.extract_strided_slice %9 {offsets = [0, 0], sizes = [8, 16], strides = [1, 1]} : vector<8x32xf32> to vector<8x16xf32>
    %16 = arith.truncf %15 : vector<8x16xf32> to vector<8x16xbf16>
    %17 = vector.extract_strided_slice %11 {offsets = [0, 0], sizes = [8, 8], strides = [1, 1]} : vector<8x16xf32> to vector<8x8xf32>
    %18 = arith.truncf %17 : vector<8x8xf32> to vector<8x8xbf16>
    %cst_17 = arith.constant dense<0.000000e+00> : vector<8x8xf32>
    %19 = tpu.matmul %14, %16, %cst_17 {dimension_numbers = #tpu.dot_dimension_numbers<[1], [1], [0], [0], [0, 0, 1, 0], [], []>} : vector<8x16xbf16>, vector<8x16xbf16>, vector<8x8xf32> -> vector<8x8xf32>
    %cst_18 = arith.constant dense<0xFF800000> : vector<8xf32>
    %20 = vector.multi_reduction <maximumf>, %19, %cst_18 [1] : vector<8x8xf32> to vector<8xf32>
    %21 = vector.shape_cast %20 : vector<8xf32> to vector<8x1xf32>
    %22 = vector.broadcast %21 : vector<8x1xf32> to vector<8x8xf32>
    %23 = arith.subf %19, %22 : vector<8x8xf32>
    %24 = math.exp %23 : vector<8x8xf32>
    %cst_19 = arith.constant dense<0.000000e+00> : vector<8xf32>
    %25 = vector.multi_reduction <add>, %24, %cst_19 [1] : vector<8x8xf32> to vector<8xf32>
    %26 = vector.shape_cast %25 : vector<8xf32> to vector<8x1xf32>
    %27 = tpu.reciprocal %26 {approx = true} : vector<8x1xf32> -> vector<8x1xf32>
    %28 = vector.broadcast %27 : vector<8x1xf32> to vector<8x8xf32>
    %29 = arith.mulf %24, %28 : vector<8x8xf32>
    %30 = arith.truncf %29 : vector<8x8xf32> to vector<8x8xbf16>
    %cst_20 = arith.constant dense<0.000000e+00> : vector<8x8xf32>
    %31 = tpu.matmul %30, %18, %cst_20 {dimension_numbers = #tpu.dot_dimension_numbers<[1], [1], [0], [0], [0, 0, 1, 0], [], []>} : vector<8x8xbf16>, vector<8x8xbf16>, vector<8x8xf32> -> vector<8x8xf32>
    %32 = arith.truncf %31 : vector<8x8xf32> to vector<8x8xbf16>
    %c0_21 = arith.constant 0 : index
    %c0_22 = arith.constant 0 : index
    %33 = vector.load %arg8[%c0_21, %c0_22] : memref<16x32xbf16, #tpu.memory_space<vmem>>, vector<8x32xbf16>
    %cst_23 = arith.constant dense<0.000000e+00> : vector<8x32xf32>
    %34 = tpu.matmul %32, %33, %cst_23 {dimension_numbers = #tpu.dot_dimension_numbers<[1], [0], [0], [1], [0, 0, 1, 1], [], []>} : vector<8x8xbf16>, vector<8x32xbf16>, vector<8x32xf32> -> vector<8x32xf32>
    %35 = arith.addf %12, %34 : vector<8x32xf32>
    %36 = vector.extract_strided_slice %7 {offsets = [0, 16], sizes = [8, 16], strides = [1, 1]} : vector<8x32xf32> to vector<8x16xf32>
    %37 = arith.truncf %36 : vector<8x16xf32> to vector<8x16xbf16>
    %38 = vector.extract_strided_slice %9 {offsets = [0, 16], sizes = [8, 16], strides = [1, 1]} : vector<8x32xf32> to vector<8x16xf32>
    %39 = arith.truncf %38 : vector<8x16xf32> to vector<8x16xbf16>
    %40 = vector.extract_strided_slice %11 {offsets = [0, 8], sizes = [8, 8], strides = [1, 1]} : vector<8x16xf32> to vector<8x8xf32>
    %41 = arith.truncf %40 : vector<8x8xf32> to vector<8x8xbf16>
    %cst_24 = arith.constant dense<0.000000e+00> : vector<8x8xf32>
    %42 = tpu.matmul %37, %39, %cst_24 {dimension_numbers = #tpu.dot_dimension_numbers<[1], [1], [0], [0], [0, 0, 1, 0], [], []>} : vector<8x16xbf16>, vector<8x16xbf16>, vector<8x8xf32> -> vector<8x8xf32>
    %cst_25 = arith.constant dense<0xFF800000> : vector<8xf32>
    %43 = vector.multi_reduction <maximumf>, %42, %cst_25 [1] : vector<8x8xf32> to vector<8xf32>
    %44 = vector.shape_cast %43 : vector<8xf32> to vector<8x1xf32>
    %45 = vector.broadcast %44 : vector<8x1xf32> to vector<8x8xf32>
    %46 = arith.subf %42, %45 : vector<8x8xf32>
    %47 = math.exp %46 : vector<8x8xf32>
    %cst_26 = arith.constant dense<0.000000e+00> : vector<8xf32>
    %48 = vector.multi_reduction <add>, %47, %cst_26 [1] : vector<8x8xf32> to vector<8xf32>
    %49 = vector.shape_cast %48 : vector<8xf32> to vector<8x1xf32>
    %50 = tpu.reciprocal %49 {approx = true} : vector<8x1xf32> -> vector<8x1xf32>
    %51 = vector.broadcast %50 : vector<8x1xf32> to vector<8x8xf32>
    %52 = arith.mulf %47, %51 : vector<8x8xf32>
    %53 = arith.truncf %52 : vector<8x8xf32> to vector<8x8xbf16>
    %cst_27 = arith.constant dense<0.000000e+00> : vector<8x8xf32>
    %54 = tpu.matmul %53, %41, %cst_27 {dimension_numbers = #tpu.dot_dimension_numbers<[1], [1], [0], [0], [0, 0, 1, 0], [], []>} : vector<8x8xbf16>, vector<8x8xbf16>, vector<8x8xf32> -> vector<8x8xf32>
    %55 = arith.truncf %54 : vector<8x8xf32> to vector<8x8xbf16>
    %c8 = arith.constant 8 : index
    %c0_28 = arith.constant 0 : index
    %56 = vector.load %arg8[%c8, %c0_28] : memref<16x32xbf16, #tpu.memory_space<vmem>>, vector<8x32xbf16>
    %cst_29 = arith.constant dense<0.000000e+00> : vector<8x32xf32>
    %57 = tpu.matmul %55, %56, %cst_29 {dimension_numbers = #tpu.dot_dimension_numbers<[1], [0], [0], [1], [0, 0, 1, 1], [], []>} : vector<8x8xbf16>, vector<8x32xbf16>, vector<8x32xf32> -> vector<8x32xf32>
    %58 = arith.addf %35, %57 : vector<8x32xf32>
    %c0_30 = arith.constant 0 : index
    %c0_31 = arith.constant 0 : index
    %c0_32 = arith.constant 0 : index
    %59 = vector.load %arg9[%c0_30, %c0_31, %c0_32] : memref<1x8x32xf32, #tpu.memory_space<vmem>>, vector<1x8x32xf32>
    %60 = vector.shape_cast %59 : vector<1x8x32xf32> to vector<8x32xf32>
    %61 = vector.shape_cast %58 : vector<8x32xf32> to vector<1x8x32xf32>
    tpu.vector_store %arg9[%c0_30, %c0_31, %c0_32], %61 {strides = array<i32>} : memref<1x8x32xf32, #tpu.memory_space<vmem>>, vector<1x8x32xf32>,
    return
  }
  func.func @transform_0(%arg0: i32, %arg1: i32) -> (i32, i32, i32) {
    %c0_i32 = arith.constant 0 : i32
    %c0_i32_0 = arith.constant 0 : i32
    return %arg0, %arg1, %c0_i32 : i32, i32, i32
  }
  func.func @transform_1(%arg0: i32, %arg1: i32) -> (i32, i32, i32) {
    %c0_i32 = arith.constant 0 : i32
    %c0_i32_0 = arith.constant 0 : i32
    %c0_i32_1 = arith.constant 0 : i32
    return %arg0, %c0_i32, %c0_i32_0 : i32, i32, i32
  }
  func.func @transform_2(%arg0: i32, %arg1: i32) -> (i32, i32, i32) {
    %c0_i32 = arith.constant 0 : i32
    %c0_i32_0 = arith.constant 0 : i32
    %c0_i32_1 = arith.constant 0 : i32
    return %arg0, %c0_i32, %c0_i32_0 : i32, i32, i32
  }
  func.func @transform_3(%arg0: i32, %arg1: i32) -> (i32, i32) {
    %c0_i32 = arith.constant 0 : i32
    %c0_i32_0 = arith.constant 0 : i32
    %c0_i32_1 = arith.constant 0 : i32
    return %c0_i32, %c0_i32_0 : i32, i32
  }
  func.func @transform_4(%arg0: i32, %arg1: i32) -> (i32, i32) {
    %c0_i32 = arith.constant 0 : i32
    %c0_i32_0 = arith.constant 0 : i32
    %c0_i32_1 = arith.constant 0 : i32
    return %c0_i32, %c0_i32_0 : i32, i32
  }
  func.func @transform_5(%arg0: i32, %arg1: i32) -> (i32, i32) {
    %c0_i32 = arith.constant 0 : i32
    %c0_i32_0 = arith.constant 0 : i32
    %c0_i32_1 = arith.constant 0 : i32
    return %c0_i32, %c0_i32_0 : i32, i32
  }
  func.func @transform_6(%arg0: i32, %arg1: i32) -> (i32, i32) {
    %c0_i32 = arith.constant 0 : i32
    %c0_i32_0 = arith.constant 0 : i32
    %c0_i32_1 = arith.constant 0 : i32
    return %c0_i32, %c0_i32_0 : i32, i32
  }
  func.func @transform_7(%arg0: i32, %arg1: i32) -> (i32, i32, i32) {
    %c0_i32 = arith.constant 0 : i32
    %c0_i32_0 = arith.constant 0 : i32
    return %arg0, %arg1, %c0_i32 : i32, i32, i32
  }
}

</mosaic_0001>

<bundles_post_ra>
// kernel: tpu_custom_call.1
= control target key start
LH: loop header
LB: loop body
LE: loop exit
PB: predicated region body
PF: predicated region fallthrough
CT: control target
= control target key end

     0   :  { %s1438_s0 = inlined_call_operand.vmem [shape: bf16[2,8,32], index: 0, kind: input, shape index: {}]   ;;  %s1439_s1 = inlined_call_operand.hbm [shape: bf16[2,8,32], index: 1, kind: input, shape index: {}]   ;;  %s1440_s2 = inlined_call_operand.hbm [shape: bf16[2,8,32], index: 2, kind: input, shape index: {}]   ;;  %s1441_s3 = inlined_call_operand.vmem [shape: bf16[32,32], index: 3, kind: input, shape index: {}]   ;;  %s1442_s4 = inlined_call_operand.hbm [shape: bf16[32,32], index: 4, kind: input, shape index: {}]   ;;  %s1443_s5 = inlined_call_operand.vmem [shape: bf16[32,16], index: 5, kind: input, shape index: {}]   ;;  %s1444_s6 = inlined_call_operand.hbm [shape: bf16[16,32], index: 6, kind: input, shape index: {}]   ;;  %s1445_s7 = inlined_call_operand.hbm [shape: f32[2,8,32], index: 7, kind: output, shape index: {}]  }
   0x1   :  { %1451 = sst [smem:[#allocation22_spill]] %s1442_s4 }
   0x2   :  { %1452 = sst [smem:[#allocation23_spill]] %s1444_s6 }
   0x3   :  { %12 = vsyncpa [#allocation3], 0 }
   0x4   :  { %14 = vsyncpa [#allocation3 + $0x1], 0 }
   0x5   :  { %15 = vsyncpa [#allocation6], 0 }
   0x6   :  { %17 = vsyncpa [#allocation6 + $0x1], 0 }
   0x7   :  { %18 = vsyncpa [#allocation9], 0 }
   0x8   :  { %19 = vsyncpa [#allocation4], 0 }
   0x9   :  { %21 = vsyncpa [#allocation4 + $0x1], 0  ;;  %s1244_s24 = smov 0   ;;  %s1246_s25 = smov 0  }
   0xa   :  { %s1248_s26 = smov 0   ;;  %s1250_s27 = smov 0  }
   0xb   :  { %s1252_s28 = smov 0   ;;  %s1254_s29 = smov 0  }
   0xc LB: > { %1453 = sst [smem:[#allocation16_spill]] %s1176_s24  ;;  %s1275_s30 = sadd.s32 4294967295, %s1196_s29   ;;  %s1196_s29 = sphi %s1254_s29, %s27_s29   ;;  %s1192_s28 = sphi %s1252_s28, %s1471_s28   ;;  %s1188_s27 = sphi %s1250_s27, %s1470_s27   ;;  %s1184_s26 = sphi %s1248_s26, %s1469_s26   ;;  %s1180_s25 = sphi %s1246_s25, %s1473_s25   ;;  %s1176_s24 = sphi %s1244_s24, %s1472_s24  }
   0xd   : > { %1454 = sst [smem:[#allocation17_spill]] %s1184_s26  ;;  %p824_p0 = scmp.ge.s32.totalorder %s1196_s29, 1 }
   0xe   : > { %1455 = sst [smem:[#allocation18_spill]] %s1192_s28  ;;  %p88_p1 = scmp.eq.s32.totalorder %s1275_s30, 0 }
   0xf   : > { %p236_p2 = scmp.lt.s32.totalorder %s1196_s29, 3  ;;  %s1456_s4 = sld [smem:[#allocation22_spill]] }
  0x10   : > { %s1198_s12 = smov [#allocation7]   ;;  %p827_p6 = scmp.ge.s32.totalorder %s1196_s29, 2 }
  0x11   : > { %p1283_p3 = pnand %p824_p0, %p236_p2  ;;  %s252_s13 = sshll.u32 %s1198_s12, 4  ;;  %s253_s13 = int_to_ptr.vmem [resolvable:$true] %s252_s13 }
  0x12   : > { %s1458_s6 = sld [smem:[#allocation23_spill]]  ;;  %s1199_s17 = smov 64  }
  0x13   : > { %p896_p4 = pneg %p1283_p3  ;;  %s1200_s18 = smov 4  }
  0x14   : > { %s1201_s19 = smov [#allocation8]   ;;  %s823_s21 = sadd.s32 4294967294, %s1196_s29  }
  0x15   : > { %s250_s10 = sshll.u32 %s1456_s4, 4  ;;  %p897_p5 = pnand %p896_p4, %p88_p1  ;;  %s251_s10 = int_to_ptr.hbm [resolvable:$true] %s250_s10 }
  0x16   : > { %s269_s20 = sshll.u32 %s1201_s19, 4  ;;  %s39_s22 = sadd.s32 1, %s1192_s28  ;;  %s270_s20 = int_to_ptr.vmem [resolvable:$true] %s269_s20 }
  0x17   : > { %899 = dma.hbm_to_vmem [thread:$0]  (!%p897_p5), %s251_s10, 256, %s253_s13, [#allocation6], %s1199_s17, %s1199_s17, %s1200_s18  }
  0x18   : > { %s267_s16 = sshll.u32 %s1458_s6, 4  ;;  %p41_p7 = scmp.ge.s32.totalorder %s39_s22, 2  ;;  %s268_s16 = int_to_ptr.hbm [resolvable:$true] %s267_s16 }
  0x19   : > { %902 = dma.hbm_to_vmem [thread:$0]  (!%p897_p5), %s268_s16, 128, %s270_s20, [#allocation9], %s1199_s17, %s1199_s17, %s1200_s18  }
  0x1a   : > { %s74_s23 = sadd.s32 1, %s1184_s26  ;;  %p81_p8 = scmp.ne.s32.totalorder %s1184_s26, %s1180_s25 }
  0x1b   : > { %p82_p9 = scmp.eq.s32.totalorder %s1196_s29, 0  ;;  %s1475_s22 = smov (%p41_p7, %s39_s22), 0 }
  0x1c   : > { %1459 = sst [smem:[#allocation19_spill]] %s1475_s22  ;;  %p87_p11 = scmp.ne.s32.totalorder %s1180_s25, %s1176_s24 }
  0x1d   : > { %p1303_p10 = por %p82_p9, %p81_p8  ;;  %s71_s9 = ssub.s32 %s1192_s28, %s1475_s22 }
  0x1e   : > { %p223_p12 = scmp.eq.s32.totalorder %s1275_s30, 1  ;;  %p72_p13 = scmp.eq.s32.totalorder %s71_s9, 0 }
  0x1f   : > { %p1314_p0 = por %p88_p1, %p87_p11  ;;  %p229_p4 = scmp.eq.s32.totalorder %s823_s21, 1 }
  0x20   : > { %p1318_p2 = por %p223_p12, %p81_p8  ;;  %p916_p7 = scmp.lt.s32.totalorder %s1196_s29, 2 }
  0x21   : > { %s1323_s13 = scalar_select %p72_p13, %s1184_s26, %s74_s23  }
  0x22   : > { %p1325_p5 = por %p229_p4, %p87_p11  ;;  %s293_s15 = sand.u32 1, %s1184_s26  }
  0x23   : > { %1463 = sst [smem:[#allocation20_spill]] %s1323_s13  ;;  %s829_s16 = sshll.u32 %s1192_s28, 2 }
  0x24   : > { %s1464_s14 = scalar_select %p1325_p5, 1, 0 }
  0x25   : > { %s828_s17 = sshll.u32 %s293_s15, 2  ;;  %s301_s20 = scalar_lea.hbm %s1439_s1, %s829_s16 }
  0x26   : > { %1465 = sst [smem:[#allocation21_spill]] %s1464_s14  ;;  %s303_s9 = sshll.u32 %s301_s20, 4  ;;  %s304_s9 = int_to_ptr.hbm [resolvable:$true] %s303_s9 }
  0x27   : > { %s297_s4 = scalar_lea.vmem [#allocation2], %s828_s17  ;;  %p904_p8 = pnand %p916_p7, %p1303_p10 }
  0x28   : > { %s305_s6 = sshll.u32 %s297_s4, 4  ;;  %s320_s22 = scalar_lea.hbm %s1440_s2, %s829_s16  ;;  %s306_s6 = int_to_ptr.vmem [resolvable:$true] %s305_s6 }
  0x29   : > { %s312_s13 = sand.u32 1, %s1196_s29   ;;  %s294_s14 = scalar_lea.sflag [#allocation3], %s293_s15 }
  0x2a   : > { %906 = dma.hbm_to_vmem [thread:$0]  (!%p904_p8), %s304_s9, 64, %s306_s6, %s294_s14  }
  0x2b   : > { %s322_s28 = sshll.u32 %s320_s22, 4  ;;  %s316_s26 = scalar_lea.vmem [#allocation5], %s828_s17  ;;  %s323_s28 = int_to_ptr.hbm [resolvable:$true] %s322_s28 }
  0x2c   : > { %s324_s24 = sshll.u32 %s316_s26, 4  ;;  %s313_s18 = scalar_lea.sflag [#allocation6], %s312_s13  ;;  %s325_s24 = int_to_ptr.vmem [resolvable:$true] %s324_s24 }
  0x2d   : > { %909 = dma.hbm_to_vmem [thread:$0]  (!%p904_p8), %s323_s28, 64, %s325_s24, %s313_s18  }
  0x2e   : > { %333 = sbr.rel (%p1283_p3) target bundleno = 979 (0x3d3), region = 48  ;;  %s1344_s4 = sand.u32 (!%p1283_p3), 1, %s1180_s25  }
  0x2f   : > { %s833_s8 = sshll.u32 (!%p1283_p3), %s1344_s4, 2  ;;  %s336_s16 = scalar_lea.sflag (!%p1283_p3), [#allocation3], %s1344_s4 }
  0x30   : > { %s339_s15 = scalar_lea.vmem (!%p1283_p3), [#allocation2], %s833_s8 }
  0x33   : > { %1155 = dma.done.wait (%p1314_p0), %s336_s16, 64  }
  0x34   : > { %1157 = vsyncadd (%p1314_p0), %s336_s16, 4294967232  ;;  %s345_s6 = sand.u32 1, %s1275_s30   ;;  %s1353_s26 = scalar_lea.vmem [#allocation5], %s833_s8 }
  0x35   : > { %s346_s24 = scalar_lea.sflag [#allocation6], %s345_s6 }
  0x36   : > { %1159 = dma.done.wait (%p1314_p0), %s346_s24, 64  }
  0x37   : > { %1161 = vsyncadd (%p1314_p0), %s346_s24, 4294967232 }
  0x38   : > { %1163 = dma.done.wait (%p88_p1), [#allocation6], 256  }
  0x39   : > { %1165 = vsyncadd (%p88_p1), [#allocation6], 4294967040 }
  0x3a   : > { %1167 = dma.done.wait (%p88_p1), [#allocation9], 128  }
  0x3b   : > { %1169 = vsyncadd (%p88_p1), [#allocation9], 4294967168  ;;  %p403_p3 = scmp.lt.s32.totalorder %s1188_s27, 1  ;;  %v877_v0 = vld [vmem:[%s1441_s3 + $0x8] sm:$0xff]  ;;  %v879_v1 = vld [vmem:[#allocation7 + $0x8] sm:$0xff]  ;;  %vm430_vm0 = vcmask 261120  }
  0x3c   : > { %440 = vmatpush.bf16.msra.mxu0 %v877_v0  ;;  %472 = vmatpush.bf16.msra.mxu1 %v879_v1  ;;  %v876_v2 = vld [vmem:[%s1441_s3] sm:$0xff]  ;;  %v878_v3 = vld [vmem:[#allocation7] sm:$0xff]  ;;  %vm514_vm1 = vcmask 130048   ;;  %s1202_s20 = smov 112   ;;  %v881_v18 = vld [vmem:[%s1443_s5 + $0x8] sm:$0xff]  ;;  %vm534_vm2 = vcmask 64512  }
  0x3d   : > { %s404_s28 = scalar_select %p403_p3, %s1188_s27, 1  ;;  %v412_v5 = vld [vmem:[%s339_s15] sm:$0xf]  ;;  %504 = vmatpush.bf16.msra.mxu2 %v881_v18  ;;  %v413_v20 = vld [vmem:[%s1353_s26] sm:$0xf]  ;;  %vm632_vm3 = vcmask 1043456  }
  0x3e   : > { %v880_v19 = vld [vmem:[%s1443_s5] sm:$0xff]  ;;  %s1203_s8 = smov 120   ;;  %s873_s16 = sshll.u32 %s1188_s27, 3 }
  0x3f   : > { %s838_s10 = sshll.u32 %s404_s28, 2  ;;  %v567_v39 = vld [vmem:[#allocation8] sm:$0xf]  ;;  %v628_v40 = vld [vmem:[#allocation8 + $0x4] sm:$0xf]  ;;  %s837_s15 = sshll.u32 %s1344_s4, 3 }
  0x40   : > { %s409_s19 = scalar_lea.vmem %s1438_s0, %s838_s10  ;;  %441 = vmatpush.bf16.msra.mxu0 %v876_v2  ;;  %473 = vmatpush.bf16.msra.mxu1 %v878_v3  ;;  %v634_v41 = vsel %vm632_vm3, %v628_v40, 0  ;;  %v653_v42 = vsel %vm632_vm3, %v567_v39, 0  ;;  %s681_s26 = scalar_lea.hbm %s1445_s7, %s873_s16 }
  0x41   : > { %v411_v4 = vld [vmem:[%s409_s19] sm:$0xf]  ;;  %505 = vmatpush.bf16.msra.mxu2 %v880_v19  ;;  %s402_s28 = scalar_lea.vmem [#allocation10], %s837_s15  ;;  %s685_s22 = sshll.u32 %s681_s26, 4  ;;  %s686_s22 = int_to_ptr.hbm [resolvable:$true] %s685_s22 }
  0x42   : > { %s683_s11 = sshll.u32 %s402_s28, 4  ;;  %s670_s10 = scalar_lea.sflag [#allocation4], %s1344_s4  ;;  %s684_s11 = int_to_ptr.vmem [resolvable:$true] %s683_s11 }
  0x43   : > { %847 = vmatmul.msk.bf16.vlgmr.msra.gmra.mxu0 %vm430_vm0, %v411_v4  ;;  %856 = vmatmul.msk.bf16.vlgmr.msra.gmra.mxu1 %vm430_vm0, %v412_v5  ;;  %s1116_s13 = sshra.s32 %s686_s22, 4  ;;  %s1122_s30 = scalar_lea.hbm %s1445_s7, 16  ;;  %s1117_s13 = int_to_ptr.hbm [resolvable:$true] %s1116_s13 }
  0x44   : > { %865 = vmatmul.msk.bf16.vlgmr.msra.gmra.mxu2 %vm430_vm0, %v413_v20  ;;  %s1118_s27 = scalar_lea.hbm %s1117_s13, 8  ;;  %p1123_p11 = scmp.lt.s32.totalorder %s1117_s13, %s1445_s7 }
  0x45   : > { %p1119_p1 = scmp.ne.s32.totalorder %s1117_s13, %s1118_s27  ;;  %p1124_p12 = scmp.lt.s32.totalorder %s1122_s30, %s1118_s27 }
  0x47   : > { %p1120_p9 = pnand %p1119_p1, %p1318_p2  ;;  %p1125_p13 = por %p1124_p12, %p1123_p11 }
  0x49   : > { %p1121_p10 = pneg %p1120_p9 }
  0x4b   : > { %p1126_p0 = pnand %p1125_p13, %p1121_p10 }
  0xc0   : > { %v443_v6 = vpop.f32.mrf.mxu0  ;;  %v475_v7 = vpop.f32.mrf.mxu1 }
  0xc1   : > { %v512_v8 = vpack.c.bf16 %v475_v7, %v475_v7  ;;  %v511_v10 = vpack.c.bf16 %v443_v6, %v443_v6 }
  0xc3   : > { %572 = vrot.lane.b32.xlu0 %v512_v8, %s1202_s20  ;;  %v519_v9 = vsel %vm514_vm1, %v512_v8, 0 }
  0xc4   : > { %528 = vmatpush.bf16.xpose.msra.mxu3 %v519_v9 }
  0xc7   : > { %v507_v27 = vpop.f32.mrf.mxu2 }
  0xc8   : > { %v445_v11 = vpop.f32.mrf.mxu0  ;;  %v477_v12 = vpop.f32.mrf.mxu1  ;;  %v513_v28 = vpack.c.bf16 %v507_v27, %v507_v27 }
  0xca   : > { %v551_v30 = vsel %vm534_vm2, %v513_v28, 0 }
  0xcb   : > { %569 = vrot.lane.b32.xlu0 %v511_v10, %s1202_s20  ;;  %866 = vmatmul.msk.bf16.vlgmr.msra.gmra.mxu3 %vm514_vm1, %v511_v10 }
  0xcc   : > { %560 = vmatpush.bf16.xpose.msrb.mxu0 %v551_v30  ;;  %643 = vmatpush.bf16.msrb.mxu3 %v634_v41 }
  0xcf   : > { %v509_v33 = vpop.f32.mrf.mxu2 }
  0xd4   : > { %662 = vmatpush.bf16.msra.mxu0 %v653_v42 }
 0x135   : > { %v573_v13 = vpop.permute.xlu0 %572 }
 0x136   : > { %v578_v14 = vsel %vm514_vm1, %v573_v13, 0 }
 0x137   : > { %587 = vmatpush.bf16.xpose.msrb.mxu1 %v578_v14 }
 0x13d   : > { %v570_v15 = vpop.permute.xlu0 %569 }
 0x13e   : > { %868 = vmatmul.msk.bf16.vlgmr.msrb.gmra.mxu1 %vm514_vm1, %v570_v15 }
 0x14e   : > { %v530_v16 = vpop.f32.mrf.mxu3 }
 0x14f   : > { %v535_v24 = vsel %vm534_vm2, %v530_v16, -inf }
 0x156   : > { %v532_v17 = vpop.f32.mrf.mxu3 }
 0x1bb   : > { %v589_v21 = vpop.f32.mrf.mxu1 }
 0x1bc   : > { %v593_v22 = vsel %vm534_vm2, %v589_v21, -inf }
 0x1bd   : > { %594 = vmax.xlane.f32.xlu1 %v593_v22 }
 0x1c3   : > { %v591_v23 = vpop.f32.mrf.mxu1 }
 0x1c5   : > { %536 = vmax.xlane.f32.xlu1 %v535_v24 }
 0x230   : > { %v595_v25 = vpop.xlane.xlu1 %594 }
 0x231   : > { %v596_v26 = vsub.f32 %v589_v21, %v595_v25 }
 0x233   : > { %v597_v29 = vmul.f32 1.442695, %v596_v26 }
 0x235   : > { %974 = vpow2.f32 %v597_v29 }
 0x238   : > { %v537_v31 = vpop.xlane.xlu1 %536 }
 0x239   : > { %v538_v32 = vsub.f32 %v530_v16, %v537_v31 }
 0x23b   : > { %v975_v34 = vpop.eup %974  ;;  %v539_v35 = vmul.f32 1.442695, %v538_v32 }
 0x23c   : > { %v599_v36 = vsel %vm534_vm2, %v975_v34, 0.0 }
 0x23d   : > { %976 = vpow2.f32 %v539_v35  ;;  %600 = vadd.xlane.f32.xlu2 %v599_v36 }
 0x243   : > { %v977_v37 = vpop.eup %976 }
 0x244   : > { %v541_v38 = vsel %vm534_vm2, %v977_v37, 0.0 }
 0x245   : > { %542 = vadd.xlane.f32.xlu0 %v541_v38 }
 0x255   : > { %606 = vrot.lane.b32.xlu2 %v513_v28, %s1203_s8 }
 0x2b0   : > { %v601_v43 = vpop.xlane.xlu2 %600 }
 0x2b1   : > { %978 = vrcp.f32 %v601_v43 }
 0x2b7   : > { %v979_v44 = vpop.eup %978 }
 0x2b8   : > { %v607_v45 = vpop.permute.xlu2 %606  ;;  %v543_v46 = vpop.xlane.xlu0 %542  ;;  %v603_v48 = vmul.f32 %v979_v44, %v975_v34 }
 0x2b9   : > { %980 = vrcp.f32 %v543_v46  ;;  %v612_v47 = vsel %vm534_vm2, %v607_v45, 0 }
 0x2ba   : > { %621 = vmatpush.bf16.xpose.msrb.mxu2 %v612_v47  ;;  %v604_v50 = vpack.c.bf16 %v603_v48, %v603_v48 }
 0x2bf   : > { %v981_v49 = vpop.eup %980 }
 0x2c0   : > { %v545_v51 = vmul.f32 %v981_v49, %v977_v37 }
 0x2c1   : > { %869 = vmatmul.msk.bf16.vlgmr.msrb.gmra.mxu2 %vm534_vm2, %v604_v50 }
 0x2c2   : > { %v546_v52 = vpack.c.bf16 %v545_v51, %v545_v51 }
 0x2c4   : > { %867 = vmatmul.msk.bf16.vlgmr.msrb.gmra.mxu0 %vm534_vm2, %v546_v52 }
 0x341   : > { %v562_v53 = vpop.f32.mrf.mxu0 }
 0x342   : > { %v566_v54 = vpack.c.bf16 %v562_v53, %v562_v53 }
 0x344   : > { %v623_v55 = vpop.f32.mrf.mxu2  ;;  %871 = vmatmul.msk.bf16.vlgmr.msra.gmra.mxu0 %vm534_vm2, %v566_v54 }
 0x345   : > { %v627_v56 = vpack.c.bf16 %v623_v55, %v623_v55 }
 0x347   : > { %870 = vmatmul.msk.bf16.vlgmr.msrb.gmra.mxu3 %vm534_vm2, %v627_v56 }
 0x349   : > { %v564_v57 = vpop.f32.mrf.mxu0 }
 0x34c   : > { %v625_v58 = vpop.f32.mrf.mxu2 }
 0x3c1   : > { %v664_v59 = vpop.f32.mrf.mxu0 }
 0x3c9   : > { %v666_v60 = vpop.f32.mrf.mxu0 }
 0x3ca   : > { %v645_v61 = vpop.f32.mrf.mxu3 }
 0x3cb   : > { %v665_v62 = vadd.f32 %v664_v59, %v645_v61 }
 0x3cd   : > { %668 = vst.msk [vmem:[%s402_s28] sm:$0xff] %vm430_vm0, %v665_v62 }
 0x3ce   : > { %1129 = shalt.err (!%p1126_p0)
}
 0x3cf   : > { %894 = dma.vmem_to_hbm [thread:$0]  (%p1318_p2), %s684_s11, 128, %s686_s22, %s670_s10  }
 0x3d2   : > { %v647_v63 = vpop.f32.mrf.mxu3 }
 0x3d3 PF: > { %s1466_s4 = sld [smem:[#allocation16_spill]]  ;;  %p911_p4 = pnand %p827_p6, %p1325_p5 }
 0x3d5   : > { %p912_p7 = pneg %p911_p4 }
 0x3d9   : > { %s697_s21 = sand.u32 1, %s1466_s4  }
 0x3da   : > { %s698_s23 = scalar_lea.sflag [#allocation4], %s697_s21 }
 0x3db   : > { %1171 = dma.done.wait (%p912_p7), %s698_s23, 128  }
 0x3dc   : > { %1173 = vsyncadd (%p912_p7), %s698_s23, 4294967168  ;;  %s27_s29 = sadd.s32 1, %s1196_s29   ;;  %s1468_s18 = sld [smem:[#allocation17_spill]] }
 0x3dd   : > { %p24_p8 = scmp.ge.s32.totalorder %s27_s29, 4   ;;  %s1469_s26 = sld [smem:[#allocation20_spill]] }
 0x3de   : > { %s1470_s27 = sld [smem:[#allocation18_spill]]  ;;  %s1472_s24 = smov %s1180_s25 }
 0x3df   : > { %s1471_s28 = sld [smem:[#allocation19_spill]]  ;;  %26 = sbr.rel (!%p24_p8) target bundleno = 12 (0xc), region = 117 }
 0x3e2   : > { %s1473_s25 = smov %s1468_s18 }
 0x3e4   :  { %704 = vsyncpa [#allocation3], 1 }
 0x3e5   :  { %706 = vsyncpa [#allocation3 + $0x1], 1 }
 0x3e6   :  { %707 = vsyncpa [#allocation6], 1 }
 0x3e7   :  { %709 = vsyncpa [#allocation6 + $0x1], 1 }
 0x3e8   :  { %710 = vsyncpa [#allocation9], 1 }
 0x3e9   :  { %711 = vsyncpa [#allocation4], 1 }
 0x3ea   :  { %713 = vsyncpa [#allocation4 + $0x1], 1 }

</bundles_post_ra>
